<compile_context>
chip_gen: v6e
topology: v6e:2x2x1
jax: 0.10.0
libtpu: 0.0.40
codegen_flags: <defaults>
</compile_context>

<pallas_src>
import functools

import jax
import jax.numpy as jnp
from jax.experimental import pallas as pl
from jax.experimental.pallas import tpu as pltpu


def _ce_block_kernel(logits_ref, tgt_ref, out_ref, *, n_rows, tm):
    """Partial sum over one row-block of -log_softmax(logits)[target]."""
    i = pl.program_id(0)

    x = logits_ref[...].astype(jnp.float32)            # (TM, C) upcast in vregs
    t = tgt_ref[...]                                    # (TM, 1) int32

    # Mask rows past the true batch size (last tile may contain padding/garbage).
    row = jax.lax.broadcasted_iota(jnp.int32, (tm, 1), 0) + i * tm
    valid = row < n_rows                                # (TM, 1) bool

    # Numerically stable LSE; reuse (x - m) for the target pick (single pass
    # over the tile instead of re-reading x).
    m = jnp.max(x, axis=-1, keepdims=True)              # (TM, 1)
    xs = x - m                                          # (TM, C)
    lse = jnp.log(jnp.sum(jnp.exp(xs), axis=-1, keepdims=True))      # (TM, 1)

    cls = jax.lax.broadcasted_iota(jnp.int32, xs.shape, 1)           # (TM, C)
    picked = jnp.sum(jnp.where(cls == t, xs, 0.0), axis=-1, keepdims=True)

    per_sample = lse - picked                           # = -log_softmax[target]
    per_sample = jnp.where(valid, per_sample, 0.0)      # zero out padded rows
    block_sum = jnp.sum(per_sample)                     # scalar partial sum

    # Lane-dense (8, 128) output slab per block: unmasked vst, no partial stores.
    out_ref[...] = jnp.full((8, 128), block_sum, dtype=jnp.float32)


def set_criterion(output, target):
    """Cross-entropy (mean reduction): output (N, C), target (N,) int indices.

    Matches torch.nn.CrossEntropyLoss() defaults; assumes all targets are
    valid in [0, C) (no ignore_index handling, module uses default args).
    """
    n, c = output.shape
    tgt2d = target.astype(jnp.int32).reshape(n, 1)

    # Rows per block: multiple of 8, ~2 MiB per input buffer so the
    # double-buffered pipeline fits the scoped-VMEM budget on v5e/v6e/v7x.
    bytes_per_row = c * jnp.dtype(output.dtype).itemsize
    tm = (max(1, (2 << 20) // bytes_per_row) // 8) * 8
    tm = max(8, min(tm, 1024))
    tm = min(tm, ((n + 7) // 8) * 8)
    num_blocks = pl.cdiv(n, tm)

    # TODO(synk): very large C (tens of thousands of classes) would need a
    # second grid axis over C with an online (flash-style) LSE; here the full
    # class row must fit in one block.
    kernel = functools.partial(_ce_block_kernel, n_rows=n, tm=tm)

    partials = pl.pallas_call(
        kernel,
        out_shape=jax.ShapeDtypeStruct((8, 128 * num_blocks), jnp.float32),
        grid_spec=pltpu.PrefetchScalarGridSpec(
            num_scalar_prefetch=0,
            grid=(num_blocks,),
            in_specs=[
                pl.BlockSpec((tm, c), lambda i: (i, 0)),
                pl.BlockSpec((tm, 1), lambda i: (i, 0)),
            ],
            out_specs=pl.BlockSpec((8, 128), lambda i: (0, i)),
        ),
        compiler_params=pltpu.CompilerParams(
            dimension_semantics=("parallel",),
            vmem_limit_bytes=32 << 20,
        ),
    )(output, tgt2d)   # stream the native dtype (no wrapper-side f32 upcast)

    per_block = partials[0, ::128]                      # (num_blocks,)
    return jnp.sum(per_block) / jnp.float32(n)          # true-N mean


if __name__ == "__main__":
    key = jax.random.PRNGKey(0)
    k1, k2 = jax.random.split(key)

    N, C = 8, 32  # small shapes: batch=8 samples, 32 classes
    logits = jax.random.normal(k1, (N, C), dtype=jnp.float32)
    targets = jax.random.randint(k2, (N,), 0, C, dtype=jnp.int32)

    loss = set_criterion(logits, targets)
    jax.block_until_ready(loss)

    # reference check in plain JAX (same math as torch.nn.CrossEntropyLoss)
    log_probs = jax.nn.log_softmax(logits, axis=-1)
    ref = -jnp.mean(jnp.take_along_axis(log_probs, targets[:, None], axis=-1))
    assert jnp.allclose(loss, ref, atol=1e-5, rtol=1e-5), (loss, ref)

    print("KERNEL_OK")
</pallas_src>

<mosaic_0001>
module attributes {stable_mosaic.version = 11 : i64} {
  func.func @_ce_block_kernel(%arg0: i32, %arg1: memref<8x32xf32, #tpu.memory_space<vmem>>, %arg2: memref<8x1xi32, #tpu.memory_space<vmem>>, %arg3: memref<8x128xf32, #tpu.memory_space<vmem>>) attributes {dimension_semantics = [#tpu.dimension_semantics<parallel>], iteration_bounds = array<i64: 1>, scalar_prefetch = 0 : i64, scratch_operands = 0 : i64, tpu.core_type = #tpu.core_type<tc>, window_params = [{transform_indices = @transform_0, window_bounds = array<i64: 8, 32>}, {transform_indices = @transform_1, window_bounds = array<i64: 8, 1>}, {transform_indices = @transform_2, window_bounds = array<i64: 8, 128>}]} {
    %c0 = arith.constant 0 : index
    %c0_0 = arith.constant 0 : index
    %0 = vector.load %arg1[%c0, %c0_0] : memref<8x32xf32, #tpu.memory_space<vmem>>, vector<8x32xf32>
    %c0_1 = arith.constant 0 : index
    %c0_2 = arith.constant 0 : index
    %1 = vector.load %arg2[%c0_1, %c0_2] : memref<8x1xi32, #tpu.memory_space<vmem>>, vector<8x1xi32>
    %2 = tpu.iota {dimensions = array<i32: 0>} : vector<8x1xi32>
    %c8_i32 = arith.constant 8 : i32
    %3 = arith.muli %arg0, %c8_i32 : i32
    %4 = vector.broadcast %3 : i32 to vector<8x1xi32>
    %5 = arith.addi %2, %4 : vector<8x1xi32>
    %c8_i32_3 = arith.constant 8 : i32
    %6 = vector.broadcast %c8_i32_3 : i32 to vector<8x1xi32>
    %7 = arith.cmpi slt, %5, %6 : vector<8x1xi32>
    %cst = arith.constant dense<0xFF800000> : vector<8xf32>
    %8 = vector.multi_reduction <maximumf>, %0, %cst [1] : vector<8x32xf32> to vector<8xf32>
    %9 = vector.shape_cast %8 : vector<8xf32> to vector<8x1xf32>
    %10 = vector.broadcast %9 : vector<8x1xf32> to vector<8x32xf32>
    %11 = arith.subf %0, %10 : vector<8x32xf32>
    %12 = math.exp %11 : vector<8x32xf32>
    %cst_4 = arith.constant dense<0.000000e+00> : vector<8xf32>
    %13 = vector.multi_reduction <add>, %12, %cst_4 [1] : vector<8x32xf32> to vector<8xf32>
    %14 = vector.shape_cast %13 : vector<8xf32> to vector<8x1xf32>
    %15 = math.log %14 : vector<8x1xf32>
    %16 = tpu.iota {dimensions = array<i32: 1>} : vector<8x32xi32>
    %17 = vector.broadcast %1 : vector<8x1xi32> to vector<8x32xi32>
    %18 = arith.cmpi eq, %16, %17 : vector<8x32xi32>
    %cst_5 = arith.constant 0.000000e+00 : f32
    %19 = vector.broadcast %cst_5 : f32 to vector<8x32xf32>
    %20 = arith.select %18, %11, %19 : vector<8x32xi1>, vector<8x32xf32>
    %cst_6 = arith.constant dense<0.000000e+00> : vector<8xf32>
    %21 = vector.multi_reduction <add>, %20, %cst_6 [1] : vector<8x32xf32> to vector<8xf32>
    %22 = vector.shape_cast %21 : vector<8xf32> to vector<8x1xf32>
    %23 = arith.subf %15, %22 : vector<8x1xf32>
    %cst_7 = arith.constant 0.000000e+00 : f32
    %24 = vector.broadcast %cst_7 : f32 to vector<8x1xf32>
    %25 = arith.select %7, %23, %24 : vector<8x1xi1>, vector<8x1xf32>
    %26 = vector.shape_cast %25 : vector<8x1xf32> to vector<1x8x1xf32>
    %cst_8 = arith.constant dense<0.000000e+00> : vector<1xf32>
    %27 = vector.multi_reduction <add>, %26, %cst_8 [1, 2] : vector<1x8x1xf32> to vector<1xf32>
    %28 = vector.shape_cast %27 : vector<1xf32> to vector<1x1x1xf32>
    %29 = vector.extract %28[0, 0, 0] : f32 from vector<1x1x1xf32>
    %30 = vector.broadcast %29 : f32 to vector<8x128xf32>
    %c0_9 = arith.constant 0 : index
    %c0_10 = arith.constant 0 : index
    %31 = vector.load %arg3[%c0_9, %c0_10] : memref<8x128xf32, #tpu.memory_space<vmem>>, vector<8x128xf32>
    tpu.vector_store %arg3[%c0_9, %c0_10], %30 {strides = array<i32>} : memref<8x128xf32, #tpu.memory_space<vmem>>, vector<8x128xf32>,
    return
  }
  func.func @transform_0(%arg0: i32) -> (i32, i32) {
    %c0_i32 = arith.constant 0 : i32
    %c0_i32_0 = arith.constant 0 : i32
    return %arg0, %c0_i32 : i32, i32
  }
  func.func @transform_1(%arg0: i32) -> (i32, i32) {
    %c0_i32 = arith.constant 0 : i32
    %c0_i32_0 = arith.constant 0 : i32
    return %arg0, %c0_i32 : i32, i32
  }
  func.func @transform_2(%arg0: i32) -> (i32, i32) {
    %c0_i32 = arith.constant 0 : i32
    %c0_i32_0 = arith.constant 0 : i32
    return %c0_i32, %arg0 : i32, i32
  }
}

</mosaic_0001>

<bundles_post_ra>
// kernel: tpu_custom_call.1
= control target key start
LH: loop header
LB: loop body
LE: loop exit
PB: predicated region body
PF: predicated region fallthrough
CT: control target
= control target key end

     0   :  { %vm20_vm0 = vcmask 261120   ;;  %s131_s0 = inlined_call_operand.vmem [shape: f32[8,32], index: 0, kind: input, shape index: {}]   ;;  %s132_s1 = inlined_call_operand.vmem [shape: s32[8,1], index: 1, kind: input, shape index: {}]   ;;  %s133_s2 = inlined_call_operand.hbm [shape: f32[8,128], index: 2, kind: output, shape index: {}]  }
   0x1   :  { %v12_v0 = vld [vmem:[%s131_s0] sm:$0xff] }
   0x2   :  { %7 = vsyncpa [#allocation3], 0  ;;  %v21_v1 = vsel %vm20_vm0, %v12_v0, -inf  ;;  %v102_v2 = vmov 0   ;;  %v13_v3 = vld [vmem:[%s132_s1] sm:$0xff]  ;;  %v32_v7 = vlaneseq  ;;  %vm44_vm2 = vcmask 7168  }
   0x3   :  { %75 = vset.pattern.permute.xlu0 %v102_v2  ;;  %s103_s0 = smov [#allocation2]  }
   0x4   :  { %22 = vmax.xlane.f32.xlu0 %v21_v1  ;;  %v33_v8 = vand.u32 127, %v32_v7  ;;  %s63_s1 = sshll.u32 %s103_s0, 4  ;;  %s64_s1 = int_to_ptr.vmem [resolvable:$true] %s63_s1 }
   0x5   :  { %s80_s14 = scalar_lea.vmem %s64_s1, 128  ;;  %p85_p1 = scmp.lt.s32.totalorder %s64_s1, %s64_s1 }
   0x6   :  { %p81_p0 = scmp.ne.s32.totalorder %s64_s1, %s80_s14  ;;  %p86_p2 = scmp.lt.s32.totalorder %s80_s14, %s80_s14 }
   0x8   :  { %p87_p3 = por %p86_p2, %p85_p1 }
   0xa   :  { %p88_p4 = pnand %p87_p3, %p81_p0 }
  0x1a   :  { %35 = vperm.xlu0 %75, %v13_v3  }
  0x8d   :  { %v23_v4 = vpop.xlane.xlu0 %22 }
  0x8e   :  { %v24_v5 = vsub.f32 %v12_v0, %v23_v4 }
  0x90   :  { %v25_v6 = vmul.f32 1.442695, %v24_v5 }
  0x92   :  { %76 = vpow2.f32 %v25_v6 }
  0x95   :  { %v36_v9 = vpop.permute.xlu0 %35 }
  0x96   :  { %vm37_vm1 = vcmp.eq.s32.totalorder %v33_v8, %v36_v9 }
  0x97   :  { %v38_v12 = vsel %vm37_vm1, %v24_v5, 0.0 }
  0x98   :  { %v39_v13 = vsel %vm20_vm0, %v38_v12, 0.0 }
  0x9f   :  { %v77_v10 = vpop.eup %76 }
  0xa0   :  { %v27_v11 = vsel %vm20_vm0, %v77_v10, 0.0 }
  0xa1   :  { %28 = vadd.xlane.f32.xlu1 %v27_v11 }
  0xa5   :  { %40 = vadd.xlane.f32.xlu1 %v39_v13 }
 0x12a   :  { %v29_v14 = vpop.xlane.xlu1 %28 }
 0x12b   :  { %78 = vlog2.f32 %v29_v14 }
 0x12e   :  { %v41_v17 = vpop.xlane.xlu1 %40 }
 0x138   :  { %v79_v15 = vpop.eup %78 }
 0x139   :  { %v31_v16 = vmul.f32 0.6931472, %v79_v15 }
 0x13b   :  { %v42_v18 = vsub.f32 %v31_v16, %v41_v17 }
 0x13d   :  { %v45_v19 = vsel %vm44_vm2, %v42_v18, 0.0 }
 0x13e   :  { %46 = vadd.xlane.f32.xlu1 %v45_v19 }
 0x1c7   :  { %v47_v20 = vpop.xlane.xlu1 %46 }
 0x1c8   :  { %v48_v21 = vrot.slane %v47_v20, 4 }
 0x1ca   :  { %v49_v22 = vadd.f32 %v48_v21, %v47_v20 }
 0x1cc   :  { %v50_v23 = vrot.slane %v49_v22, 2 }
 0x1ce   :  { %v51_v24 = vadd.f32 %v50_v23, %v49_v22 }
 0x1d0   :  { %v52_v25 = vrot.slane %v51_v24, 1 }
 0x1d2   :  { %v53_v26 = vadd.f32 %v52_v25, %v51_v24 }
 0x1d4   :  { %71 = vpush %v53_v26 }
 0x205   :  { %s72_s13 = spop %71 }
 0x206   :  { %v55_v27 = vstv %s72_s13 }
 0x207   :  { %56 = vst [vmem:[#allocation2] sm:$0xff] %v55_v27 }
 0x208   :  { %91 = shalt.err (!%p88_p4)
}
 0x209   :  { %66 = dma.vmem_to_hbm [thread:$0]  %s64_s1, 128, %s133_s2, [#allocation3]  }
 0x20a   :  { %100 = dma.done.wait [#allocation3], 128  }
 0x20b   :  { %101 = vsyncadd [#allocation3], 4294967168 }
 0x20c   :  { %70 = vsyncpa [#allocation3], 1 }

</bundles_post_ra>
